<compile_context>
chip_gen: v6e
topology: v6e:2x2x1
jax: 0.10.0
libtpu: 0.0.40
codegen_flags: <defaults>
</compile_context>

<pallas_src>
import jax
import jax.numpy as jnp
import numpy as np
from jax.experimental import pallas as pl
from jax.experimental.pallas import tpu as pltpu


def attflat_kernel(x_ref, w1_ref, b1_ref, w2_ref, b2_ref, wm_ref, bm_ref, out_ref):
    x = x_ref[...]                                   # (BB, L, H) bf16
    BB, L, H = x.shape

    # ---- MLP: Linear(H->H) + ReLU (+ Dropout == identity), then Linear(H->1) ----
    # Merge batch*seq rows into one bf16 GEMM with fp32 accumulation (L % 8 == 0 so the
    # reshape is a layout no-op).
    h = jnp.dot(x.reshape(BB * L, H), w1_ref[...],
                preferred_element_type=jnp.float32) + b1_ref[...]       # (BB*L, H) fp32
    h = jnp.maximum(h, 0.0)
    # TODO(synk): Dropout inside MLP/FC treated as identity (inference semantics).

    # H -> 1 projection as a VPU multiply + lane reduction; logits land as (BB, L)
    # with L on the lane axis so the softmax reductions stay lane-local.
    w2_row = w2_ref[...].reshape(1, 1, H)
    logits = jnp.sum(h.reshape(BB, L, H) * w2_row, axis=-1) + b2_ref[...]   # (BB, L) fp32

    # ---- softmax over the sequence axis (torch dim=1), fp32 throughout ----
    m = jnp.max(logits, axis=-1, keepdims=True)
    e = jnp.exp(logits - m)
    att = e * pl.reciprocal(jnp.sum(e, axis=-1, keepdims=True), approx=True)  # (BB, L)

    # ---- attention-weighted pooling over L: fp32 VPU weighted sum (no MXU M=1 matmul,
    # no bf16 cast of att; bf16 x promotes to fp32 elementwise). ----
    x_atted = jnp.sum(att[:, :, None] * x, axis=1)                      # (BB, H) fp32

    # ---- linear_merge (bf16 operands, fp32 accumulation) ----
    out_ref[...] = jnp.dot(x_atted.astype(jnp.bfloat16), wm_ref[...],
                           preferred_element_type=jnp.float32) + bm_ref[...]


def _vmem_limit_bytes():
    """Generation-aware scoped-VMEM limit: 3/4 of physical, capped at 96 MiB."""
    try:
        cap = int(pltpu.get_tpu_info().vmem_capacity_bytes)
    except Exception:
        cap = 64 << 20          # conservative fallback (v7x per-TC size)
    return int(min(cap * 3 // 4, 96 << 20))


def _pick_block_b(B, L, H, vmem_budget_bytes, min_grid_steps=2):
    """Largest batch block whose working set fits the budget, keeping >=2 grid steps
    (v7x has 2 TensorCores) whenever the batch allows it."""
    # Per-batch-row working set: bf16 x double-buffered (2*2*L*H) + fp32 h (4*L*H)
    # + fp32 pooling temporary (4*L*H).
    bytes_per_row = L * H * (2 * 2 + 4 + 4)
    cap = max(1, int(vmem_budget_bytes // bytes_per_row))
    divisors = [d for d in range(1, B + 1) if B % d == 0 and d <= cap]
    multi_step = [d for d in divisors if B // d >= min_grid_steps]
    return max(multi_step) if multi_step else max(divisors)


def att_flat(x, params, *, block_b=None):
    B, L, H = x.shape
    F = params["wm"].shape[1]
    assert L % 8 == 0, "sequence length must be sublane-aligned (pad + mask otherwise)"
    assert H % 128 == 0 and F % 128 == 0, "feature dims must be lane-dense"

    vmem_limit = _vmem_limit_bytes()
    if block_b is None:
        # Reserve ~1/3 of the limit for the streamed x block; rest covers weights,
        # output, and compiler scratch.
        block_b = _pick_block_b(B, L, H, vmem_limit // 3)
    block_b = min(block_b, B)
    assert B % block_b == 0, "batch must be divisible by the batch block"

    # Ship x as bf16: halves the dominant HBM->VMEM DMA inside the kernel.
    x = x.astype(jnp.bfloat16)

    weights = [params["w1"], params["b1"], params["w2_row"],
               params["b2"], params["wm"], params["bm"]]

    def const_spec(arr):
        nd = arr.ndim
        return pl.BlockSpec(arr.shape, lambda i, _nd=nd: (0,) * _nd)

    in_specs = [pl.BlockSpec((block_b, L, H), lambda i: (i, 0, 0))] + \
               [const_spec(w) for w in weights]
    out_specs = pl.BlockSpec((block_b, F), lambda i: (i, 0))

    return pl.pallas_call(
        attflat_kernel,
        out_shape=jax.ShapeDtypeStruct((B, F), jnp.float32),
        grid_spec=pltpu.PrefetchScalarGridSpec(
            num_scalar_prefetch=0,
            grid=(pl.cdiv(B, block_b),),
            in_specs=in_specs,
            out_specs=out_specs,
        ),
        compiler_params=pltpu.CompilerParams(
            dimension_semantics=("parallel",),   # batch blocks are independent
            vmem_limit_bytes=vmem_limit,
        ),
    )(x, *weights)


def init_params(key, hidden_size, flat_out_size):
    ks = jax.random.split(key, 6)
    s = 1.0 / np.sqrt(hidden_size)
    w1 = jax.random.normal(ks[0], (hidden_size, hidden_size), jnp.float32) * s  # (in, out) == torch W.T
    b1 = jax.random.uniform(ks[1], (1, hidden_size), jnp.float32, -s, s)
    w2 = jax.random.normal(ks[2], (1, hidden_size), jnp.float32) * s            # mid -> 1 weight (row)
    b2 = jax.random.uniform(ks[3], (1, 1), jnp.float32, -s, s)
    wm = jax.random.normal(ks[4], (hidden_size, flat_out_size), jnp.float32) * s
    bm = jax.random.uniform(ks[5], (1, flat_out_size), jnp.float32, -s, s)
    return {
        "w1": w1.astype(jnp.bfloat16), "b1": b1,
        "w2_row": w2, "b2": b2,
        "wm": wm.astype(jnp.bfloat16), "bm": bm,
    }


def reference(x_bf16, params):
    """Pure-JAX fp32 mirror of AttFlat.forward (dropout = identity)."""
    x = x_bf16.astype(jnp.float32)
    w1 = params["w1"].astype(jnp.float32)
    wm = params["wm"].astype(jnp.float32)
    h = jnp.maximum(x @ w1 + params["b1"], 0.0)            # MLP fc + ReLU
    att = h @ params["w2_row"].T + params["b2"]            # (B, L, 1)
    att = jax.nn.softmax(att, axis=1)                      # softmax over sequence dim
    x_atted = jnp.sum(att * x, axis=1)                     # (B, H); cat over 1 slice == identity
    return x_atted @ wm + params["bm"]


if __name__ == "__main__":
    B, L, hidden_size, flat_out_size = 16, 16, 128, 128   # lane-dense feature dims

    key = jax.random.PRNGKey(0)
    pkey, xkey = jax.random.split(key)
    params = init_params(pkey, hidden_size, flat_out_size)
    x = jax.random.normal(xkey, (B, L, hidden_size), jnp.float32).astype(jnp.bfloat16)

    out = att_flat(x, params)
    jax.block_until_ready(out)

    ref = reference(x, params)
    # bf16 matmul operands + approx reciprocal => loose tolerance vs fp32 reference.
    np.testing.assert_allclose(np.asarray(out), np.asarray(ref), rtol=2e-2, atol=2e-2)

    print("KERNEL_OK")
</pallas_src>

<mosaic_0001>
module attributes {stable_mosaic.version = 11 : i64} {
  func.func @attflat_kernel(%arg0: i32, %arg1: memref<8x16x128xbf16, #tpu.memory_space<vmem>>, %arg2: memref<128x128xbf16, #tpu.memory_space<vmem>>, %arg3: memref<1x128xf32, #tpu.memory_space<vmem>>, %arg4: memref<1x128xf32, #tpu.memory_space<vmem>>, %arg5: memref<1x1xf32, #tpu.memory_space<vmem>>, %arg6: memref<128x128xbf16, #tpu.memory_space<vmem>>, %arg7: memref<1x128xf32, #tpu.memory_space<vmem>>, %arg8: memref<8x128xf32, #tpu.memory_space<vmem>>) attributes {dimension_semantics = [#tpu.dimension_semantics<parallel>], iteration_bounds = array<i64: 2>, scalar_prefetch = 0 : i64, scratch_operands = 0 : i64, tpu.core_type = #tpu.core_type<tc>, window_params = [{transform_indices = @transform_0, window_bounds = array<i64: 8, 16, 128>}, {pipeline_mode = #tpu.pipeline_mode<synchronous>, transform_indices = @transform_1, window_bounds = array<i64: 128, 128>}, {pipeline_mode = #tpu.pipeline_mode<synchronous>, transform_indices = @transform_2, window_bounds = array<i64: 1, 128>}, {pipeline_mode = #tpu.pipeline_mode<synchronous>, transform_indices = @transform_3, window_bounds = array<i64: 1, 128>}, {pipeline_mode = #tpu.pipeline_mode<synchronous>, transform_indices = @transform_4, window_bounds = array<i64: 1, 1>}, {pipeline_mode = #tpu.pipeline_mode<synchronous>, transform_indices = @transform_5, window_bounds = array<i64: 128, 128>}, {pipeline_mode = #tpu.pipeline_mode<synchronous>, transform_indices = @transform_6, window_bounds = array<i64: 1, 128>}, {transform_indices = @transform_7, window_bounds = array<i64: 8, 128>}]} {
    %c0 = arith.constant 0 : index
    %c0_0 = arith.constant 0 : index
    %c0_1 = arith.constant 0 : index
    %0 = vector.load %arg1[%c0, %c0_0, %c0_1] : memref<8x16x128xbf16, #tpu.memory_space<vmem>>, vector<8x16x128xbf16>
    %1 = vector.shape_cast %0 : vector<8x16x128xbf16> to vector<128x128xbf16>
    %c0_2 = arith.constant 0 : index
    %c0_3 = arith.constant 0 : index
    %2 = vector.load %arg2[%c0_2, %c0_3] : memref<128x128xbf16, #tpu.memory_space<vmem>>, vector<128x128xbf16>
    %cst = arith.constant dense<0.000000e+00> : vector<128x128xf32>
    %3 = tpu.matmul %1, %2, %cst {dimension_numbers = #tpu.dot_dimension_numbers<[1], [0], [0], [1], [0, 0, 1, 1], [], []>} : vector<128x128xbf16>, vector<128x128xbf16>, vector<128x128xf32> -> vector<128x128xf32>
    %c0_4 = arith.constant 0 : index
    %c0_5 = arith.constant 0 : index
    %4 = vector.load %arg3[%c0_4, %c0_5] : memref<1x128xf32, #tpu.memory_space<vmem>>, vector<1x128xf32>
    %5 = vector.broadcast %4 : vector<1x128xf32> to vector<128x128xf32>
    %6 = arith.addf %3, %5 : vector<128x128xf32>
    %cst_6 = arith.constant 0.000000e+00 : f32
    %7 = vector.broadcast %cst_6 : f32 to vector<128x128xf32>
    %8 = arith.maximumf %6, %7 : vector<128x128xf32>
    %c0_7 = arith.constant 0 : index
    %c0_8 = arith.constant 0 : index
    %9 = vector.load %arg4[%c0_7, %c0_8] : memref<1x128xf32, #tpu.memory_space<vmem>>, vector<1x128xf32>
    %10 = vector.shape_cast %9 : vector<1x128xf32> to vector<1x1x128xf32>
    %11 = vector.shape_cast %8 : vector<128x128xf32> to vector<8x16x128xf32>
    %12 = vector.broadcast %10 : vector<1x1x128xf32> to vector<8x16x128xf32>
    %13 = arith.mulf %11, %12 : vector<8x16x128xf32>
    %cst_9 = arith.constant dense<0.000000e+00> : vector<8x16xf32>
    %14 = vector.multi_reduction <add>, %13, %cst_9 [2] : vector<8x16x128xf32> to vector<8x16xf32>
    %c0_10 = arith.constant 0 : index
    %c0_11 = arith.constant 0 : index
    %15 = vector.load %arg5[%c0_10, %c0_11] : memref<1x1xf32, #tpu.memory_space<vmem>>, vector<1x1xf32>
    %16 = vector.broadcast %15 : vector<1x1xf32> to vector<8x16xf32>
    %17 = arith.addf %14, %16 : vector<8x16xf32>
    %cst_12 = arith.constant dense<0xFF800000> : vector<8xf32>
    %18 = vector.multi_reduction <maximumf>, %17, %cst_12 [1] : vector<8x16xf32> to vector<8xf32>
    %19 = vector.shape_cast %18 : vector<8xf32> to vector<8x1xf32>
    %20 = vector.broadcast %19 : vector<8x1xf32> to vector<8x16xf32>
    %21 = arith.subf %17, %20 : vector<8x16xf32>
    %22 = math.exp %21 : vector<8x16xf32>
    %cst_13 = arith.constant dense<0.000000e+00> : vector<8xf32>
    %23 = vector.multi_reduction <add>, %22, %cst_13 [1] : vector<8x16xf32> to vector<8xf32>
    %24 = vector.shape_cast %23 : vector<8xf32> to vector<8x1xf32>
    %25 = tpu.reciprocal %24 {approx = true} : vector<8x1xf32> -> vector<8x1xf32>
    %26 = vector.broadcast %25 : vector<8x1xf32> to vector<8x16xf32>
    %27 = arith.mulf %22, %26 : vector<8x16xf32>
    %28 = vector.shape_cast %27 : vector<8x16xf32> to vector<8x16x1xf32>
    %29 = arith.extf %0 : vector<8x16x128xbf16> to vector<8x16x128xf32>
    %30 = vector.broadcast %28 : vector<8x16x1xf32> to vector<8x16x128xf32>
    %31 = arith.mulf %30, %29 : vector<8x16x128xf32>
    %cst_14 = arith.constant dense<0.000000e+00> : vector<8x128xf32>
    %32 = vector.multi_reduction <add>, %31, %cst_14 [1] : vector<8x16x128xf32> to vector<8x128xf32>
    %33 = arith.truncf %32 : vector<8x128xf32> to vector<8x128xbf16>
    %c0_15 = arith.constant 0 : index
    %c0_16 = arith.constant 0 : index
    %34 = vector.load %arg6[%c0_15, %c0_16] : memref<128x128xbf16, #tpu.memory_space<vmem>>, vector<128x128xbf16>
    %cst_17 = arith.constant dense<0.000000e+00> : vector<8x128xf32>
    %35 = tpu.matmul %33, %34, %cst_17 {dimension_numbers = #tpu.dot_dimension_numbers<[1], [0], [0], [1], [0, 0, 1, 1], [], []>} : vector<8x128xbf16>, vector<128x128xbf16>, vector<8x128xf32> -> vector<8x128xf32>
    %c0_18 = arith.constant 0 : index
    %c0_19 = arith.constant 0 : index
    %36 = vector.load %arg7[%c0_18, %c0_19] : memref<1x128xf32, #tpu.memory_space<vmem>>, vector<1x128xf32>
    %37 = vector.broadcast %36 : vector<1x128xf32> to vector<8x128xf32>
    %38 = arith.addf %35, %37 : vector<8x128xf32>
    %c0_20 = arith.constant 0 : index
    %c0_21 = arith.constant 0 : index
    %39 = vector.load %arg8[%c0_20, %c0_21] : memref<8x128xf32, #tpu.memory_space<vmem>>, vector<8x128xf32>
    tpu.vector_store %arg8[%c0_20, %c0_21], %38 {strides = array<i32>} : memref<8x128xf32, #tpu.memory_space<vmem>>, vector<8x128xf32>,
    return
  }
  func.func @transform_0(%arg0: i32) -> (i32, i32, i32) {
    %c0_i32 = arith.constant 0 : i32
    %c0_i32_0 = arith.constant 0 : i32
    %c0_i32_1 = arith.constant 0 : i32
    return %arg0, %c0_i32, %c0_i32_0 : i32, i32, i32
  }
  func.func @transform_1(%arg0: i32) -> (i32, i32) {
    %c0_i32 = arith.constant 0 : i32
    %c0_i32_0 = arith.constant 0 : i32
    %c0_i32_1 = arith.constant 0 : i32
    return %c0_i32, %c0_i32_0 : i32, i32
  }
  func.func @transform_2(%arg0: i32) -> (i32, i32) {
    %c0_i32 = arith.constant 0 : i32
    %c0_i32_0 = arith.constant 0 : i32
    %c0_i32_1 = arith.constant 0 : i32
    return %c0_i32, %c0_i32_0 : i32, i32
  }
  func.func @transform_3(%arg0: i32) -> (i32, i32) {
    %c0_i32 = arith.constant 0 : i32
    %c0_i32_0 = arith.constant 0 : i32
    %c0_i32_1 = arith.constant 0 : i32
    return %c0_i32, %c0_i32_0 : i32, i32
  }
  func.func @transform_4(%arg0: i32) -> (i32, i32) {
    %c0_i32 = arith.constant 0 : i32
    %c0_i32_0 = arith.constant 0 : i32
    %c0_i32_1 = arith.constant 0 : i32
    return %c0_i32, %c0_i32_0 : i32, i32
  }
  func.func @transform_5(%arg0: i32) -> (i32, i32) {
    %c0_i32 = arith.constant 0 : i32
    %c0_i32_0 = arith.constant 0 : i32
    %c0_i32_1 = arith.constant 0 : i32
    return %c0_i32, %c0_i32_0 : i32, i32
  }
  func.func @transform_6(%arg0: i32) -> (i32, i32) {
    %c0_i32 = arith.constant 0 : i32
    %c0_i32_0 = arith.constant 0 : i32
    %c0_i32_1 = arith.constant 0 : i32
    return %c0_i32, %c0_i32_0 : i32, i32
  }
  func.func @transform_7(%arg0: i32) -> (i32, i32) {
    %c0_i32 = arith.constant 0 : i32
    %c0_i32_0 = arith.constant 0 : i32
    return %arg0, %c0_i32 : i32, i32
  }
}

</mosaic_0001>

<bundles_post_ra>
// kernel: tpu_custom_call.1
= control target key start
LH: loop header
LB: loop body
LE: loop exit
PB: predicated region body
PF: predicated region fallthrough
CT: control target
= control target key end

     0   :  { %s2482_s0 = inlined_call_operand.hbm [shape: bf16[16,16,128], index: 0, kind: input, shape index: {}]   ;;  %s2483_s1 = inlined_call_operand.hbm [shape: bf16[128,128], index: 1, kind: input, shape index: {}]   ;;  %s2484_s2 = inlined_call_operand.vmem [shape: f32[1,128], index: 2, kind: input, shape index: {}]   ;;  %s2485_s3 = inlined_call_operand.vmem [shape: f32[1,128], index: 3, kind: input, shape index: {}]   ;;  %s2486_s4 = inlined_call_operand.<no memory space> [shape: f32[1,1], index: 4, kind: input, shape index: {}]   ;;  %s2487_s5 = inlined_call_operand.hbm [shape: bf16[128,128], index: 5, kind: input, shape index: {}]   ;;  %s2488_s6 = inlined_call_operand.vmem [shape: f32[1,128], index: 6, kind: input, shape index: {}]   ;;  %s2489_s7 = inlined_call_operand.hbm [shape: f32[16,128], index: 7, kind: output, shape index: {}]  }
   0x1   :  { %v12_v0 = vstv %s2486_s4 }
   0x2   :  { %13 = vst [vmem:[#allocation2] sm:$0x1] %v12_v0 }
   0x3   :  { %14 = vsyncpa [#allocation4], 0 }
   0x4   :  { %16 = vsyncpa [#allocation4 + $0x1], 0 }
   0x5   :  { %17 = vsyncpa [#allocation7], 0 }
   0x6   :  { %18 = vsyncpa [#allocation5], 0 }
   0x7   :  { %20 = vsyncpa [#allocation5 + $0x1], 0  ;;  %s1948_s26 = smov 0   ;;  %s1950_s27 = smov 0  }
   0x8   :  { %s1952_s28 = smov 0   ;;  %s1954_s29 = smov 0  }
   0x9 LB: > { %s1969_s4 = sadd.s32 4294967295, %s1894_s29   ;;  %s1481_s30 = sadd.s32 4294967294, %s1894_s29   ;;  %s1894_s29 = sphi %s1954_s29, %s2514_s29   ;;  %s1890_s28 = sphi %s1952_s28, %s2513_s28   ;;  %s1886_s27 = sphi %s1950_s27, %s2512_s27   ;;  %s1882_s26 = sphi %s1948_s26, %s2511_s26  }
   0xa   : > { %p46_p0 = scmp.ne.s32.totalorder %s1886_s27, %s1882_s26  ;;  %p2490_p1 = scmp.eq.s32.totalorder %s1969_s4, 0 }
   0xb   : > { %p196_p2 = scmp.eq.s32.totalorder %s1969_s4, 1  ;;  %p202_p3 = scmp.eq.s32.totalorder %s1481_s30, 1 }
   0xc   : > { %p1978_p4 = por %p2490_p1, %p46_p0  ;;  %p1482_p5 = scmp.ge.s32.totalorder %s1894_s29, 1 }
   0xd   : > { %p1983_p6 = por %p202_p3, %p46_p0  ;;  %p209_p7 = scmp.lt.s32.totalorder %s1894_s29, 3 }
   0xe   : > { %s2496_s8 = scalar_select %p1978_p4, 1, 0 }
   0xf   : > { %s2497_s9 = scalar_select %p1983_p6, 1, 0 }
  0x10   : > { %p1988_p8 = pnand %p1482_p5, %p209_p7  ;;  %s1896_s11 = smov [#allocation6]  }
  0x11   : > { %s221_s12 = sshll.u32 %s1896_s11, 4  ;;  %s1897_s14 = smov [#allocation8]   ;;  %s222_s12 = int_to_ptr.vmem [resolvable:$true] %s221_s12 }
  0x12   : > { %s2498_s10 = scalar_select %p1988_p8, 1, 0 }
  0x13   : > { %p1618_p9 = pneg %p1988_p8  ;;  %s243_s15 = sshll.u32 %s1897_s14, 4  ;;  %s244_s15 = int_to_ptr.vmem [resolvable:$true] %s243_s15 }
  0x14   : > { %s1757_s16 = scalar_lea.vmem %s222_s12, 1024  ;;  %p1765_p5 = scmp.lt.s32.totalorder %s222_s12, %s222_s12 }
  0x15   : > { %p1997_p11 = pnand %p1618_p9, %p2490_p1  ;;  %p1758_p13 = scmp.ne.s32.totalorder %s222_s12, %s1757_s16 }
  0x16   : > { %p1766_p7 = scmp.lt.s32.totalorder %s1757_s16, %s1757_s16 }
  0x17   : > { %p1748_p12 = pneg %p1997_p11 }
  0x18   : > { %p1767_p10 = por %p1766_p7, %p1765_p5 }
  0x19   : > { %p1760_p0 = pnand %p1758_p13, %p1748_p12 }
  0x1b   : > { %p1761_p3 = pneg %p1760_p0 }
  0x1d   : > { %p1768_p9 = pnand %p1767_p10, %p1761_p3 }
  0x1f   : > { %1771 = shalt.err (!%p1768_p9)
}
  0x20   : > { %s2491_s17 = smov 64   ;;  %s2492_s18 = smov 4  }
  0x21   : > { %1621 = dma.hbm_to_vmem [thread:$0]  (!%p1997_p11), %s2483_s1, 1024, %s222_s12, [#allocation7], %s2491_s17, %s2491_s17, %s2492_s18  }
  0x22   : > { %s1783_s21 = scalar_lea.vmem %s244_s15, 1024  ;;  %p1791_p10 = scmp.lt.s32.totalorder %s244_s15, %s244_s15 }
  0x23   : > { %p1784_p13 = scmp.ne.s32.totalorder %s244_s15, %s1783_s21  ;;  %p1792_p3 = scmp.lt.s32.totalorder %s1783_s21, %s1783_s21 }
  0x25   : > { %p1786_p0 = pnand %p1784_p13, %p1748_p12  ;;  %p1793_p7 = por %p1792_p3, %p1791_p10 }
  0x27   : > { %p1787_p5 = pneg %p1786_p0 }
  0x29   : > { %p1794_p9 = pnand %p1793_p7, %p1787_p5 }
  0x2b   : > { %1797 = shalt.err (!%p1794_p9)
}
  0x2c   : > { %1624 = dma.hbm_to_vmem [thread:$0]  (!%p1997_p11), %s2487_s5, 1024, %s244_s15, [#allocation7], %s2491_s17, %s2491_s17, %s2492_s18  }
  0x2d   : > { %s2026_s24 = sadd.s32 1, %s1894_s29   ;;  %s33_s25 = sadd.s32 1, %s1890_s28 }
  0x2e   : > { %s30_s30 = ssub.s32 %s1894_s29, %s2026_s24  ;;  %p40_p12 = scmp.ne.s32.totalorder %s1890_s28, %s1886_s27 }
  0x2f   : > { %p31_p13 = scmp.eq.s32.totalorder %s30_s30, 0  ;;  %p41_p0 = scmp.eq.s32.totalorder %s1894_s29, 0 }
  0x30   : > { %p2036_p5 = por %p196_p2, %p40_p12  ;;  %p1635_p10 = scmp.lt.s32.totalorder %s1894_s29, 2 }
  0x31   : > { %s2042_s12 = scalar_select %p31_p13, %s1890_s28, %s33_s25  }
  0x32   : > { %s2500_s11 = scalar_select %p2036_p5, 1, 0 }
  0x33   : > { %p42_p3 = por %p41_p0, %p40_p12  ;;  %s260_s13 = sand.u32 1, %s1890_s28  }
  0x34   : > { %s1486_s14 = sshll.u32 %s260_s13, 6  ;;  %s1528_s15 = sshll.u32 %s1894_s29, 10 }
  0x35   : > { %s2049_s20 = scalar_lea.hbm %s2482_s0, %s1528_s15  ;;  %s264_s21 = scalar_lea.vmem [#allocation3], %s1486_s14 }
  0x36   : > { %s272_s22 = sshll.u32 %s264_s21, 4  ;;  %p2053_p2 = pnand %p1635_p10, %p42_p3  ;;  %s2051_s22 = int_to_ptr.vmem [resolvable:$true] %s272_s22 }
  0x37   : > { %s2057_s25 = scalar_lea.sflag [#allocation4], %s260_s13  ;;  %s1798_s30 = scalar_lea.hbm %s2049_s20, 1024 }
  0x38   : > { %p1799_p11 = scmp.ne.s32.totalorder %s2049_s20, %s1798_s30  ;;  %p1800_p7 = pneg %p2053_p2 }
  0x39   : > { %s1803_s14 = scalar_lea.hbm %s2482_s0, 2048  ;;  %p1804_p13 = scmp.lt.s32.totalorder %s2049_s20, %s2482_s0 }
  0x3a   : > { %p1801_p9 = pnand %p1800_p7, %p1799_p11  ;;  %p1805_p0 = scmp.lt.s32.totalorder %s1803_s14, %s1798_s30 }
  0x3c   : > { %p1802_p12 = pneg %p1801_p9  ;;  %p1806_p10 = por %p1805_p0, %p1804_p13 }
  0x3e   : > { %p1807_p3 = pnand %p1806_p10, %p1802_p12 }
  0x40   : > { %1810 = shalt.err (!%p1807_p3)
}
  0x41   : > { %s1811_s13 = scalar_lea.vmem %s2051_s22, 1024  ;;  %s1900_s17 = smov [#allocation3]  }
  0x42   : > { %p1812_p1 = scmp.ne.s32.totalorder %s2051_s22, %s1811_s13  ;;  %s1816_s18 = sshll.u32 %s1900_s17, 4  ;;  %s1817_s18 = int_to_ptr.vmem [resolvable:$false] %s1816_s18 }
  0x43   : > { %s1818_s15 = scalar_lea.vmem %s1817_s18, 2048  ;;  %p1819_p9 = scmp.lt.s32.totalorder %s2051_s22, %s1817_s18 }
  0x44   : > { %p1814_p6 = pnand %p1812_p1, %p1800_p7  ;;  %p1820_p5 = scmp.lt.s32.totalorder %s1818_s15, %s1811_s13 }
  0x46   : > { %p1815_p11 = pneg %p1814_p6  ;;  %p1821_p4 = por %p1820_p5, %p1819_p9 }
  0x48   : > { %p1822_p8 = pnand %p1821_p4, %p1815_p11 }
  0x4a   : > { %1825 = shalt.err (!%p1822_p8)
}
  0x4b   : > { %s2502_s30 = smov 4   ;;  %s2503_s16 = smov 64  }
  0x4c   : > { %1628 = dma.hbm_to_vmem [thread:$0]  (!%p2053_p2), %s2049_s20, 1024, %s2051_s22, %s2057_s25, %s2503_s16, %s2503_s16, %s2502_s30  }
  0x4d   : > { %p2504_p1 = scmp.ne.s32.totalorder %s2498_s10, 0 }
  0x4e   : > { %s2084_s17 = sand.u32 (!%p2504_p1), 1, %s1886_s27   ;;  %p2505_p4 = scmp.ne.s32.totalorder (!%p2504_p1), %s2496_s8, 0 }
  0x4f   : > { %284 = sbr.rel (%p2504_p1) target bundleno = 1403 (0x57b), region = 48  ;;  %s1491_s18 = sshll.u32 (!%p2504_p1), %s2084_s17, 6 }
  0x50   : > { %s287_s14 = scalar_lea.sflag (!%p2504_p1), [#allocation4], %s2084_s17  ;;  %s2088_s19 = scalar_lea.vmem (!%p2504_p1), [#allocation3], %s1491_s18 }
  0x54   : > { %1869 = dma.done.wait (%p2505_p4), %s287_s14, 1024  }
  0x55   : > { %1871 = vsyncadd (%p2505_p4), %s287_s14, 4294966272  ;;  %p2506_p6 = scmp.eq.s32.totalorder %s1969_s4, 0 }
  0x57   : > { %1873 = dma.done.wait (%p2506_p6), [#allocation7], 2048   ;;  %p2507_p8 = pmov %p2506_p6 }
  0x58   : > { %v1680_v1 = vld [vmem:[#allocation6 + $0x38] sm:$0xff]   ;;  %v1681_v2 = vld [vmem:[#allocation6 + $0x30] sm:$0xff]   ;;  %v1682_v3 = vld [vmem:[#allocation6 + $0x28] sm:$0xff]   ;;  %v1901_v17 = vmov 0   ;;  %vm687_vm0 = vcmask 130112   ;;  %vm752_vm1 = vcmask 1041409  }
  0x59   : > { %1875 = vsyncadd (%p2507_p8), [#allocation7], 4294965248  ;;  %1554 = vmatprep.subr.bf16.mxu0 %v1680_v1  ;;  %v1683_v4 = vld [vmem:[#allocation6 + $0x20] sm:$0xff]   ;;  %v1684_v6 = vld [vmem:[#allocation6 + $0x18] sm:$0xff]   ;;  %1678 = vset.pattern.permute.xlu0 %v1901_v17  ;;  %vm754_vm2 = vcmask 1042434   ;;  %vm756_vm3 = vcmask 1043459  }
  0x5a   : > { %1555 = vmatpush3.bf16.msra.mxu0 %v1680_v1  ;;  %v2099_v5 = vld [vmem:[%s2088_s19] sm:$0xff]   ;;  %v1685_v7 = vld [vmem:[#allocation6 + $0x10] sm:$0xff]   ;;  %v1686_v8 = vld [vmem:[#allocation6 + $0x8] sm:$0xff]   ;;  %1679 = vset.pattern.permute.xlu1 %v1901_v17  ;;  %vm758_vm4 = vcmask 1044484   ;;  %vm760_vm5 = vcmask 1045509   ;;  %vm762_vm6 = vcmask 1046534  }
  0x5b   : > { %1556 = vmatprep.subr.bf16.mxu0 %v1681_v2  ;;  %1570 = vmatprep.mubr.bf16.mxu0 %v2099_v5  ;;  %v1687_v9 = vld [vmem:[#allocation6] sm:$0xff]   ;;  %v2103_v10 = vld [vmem:[%s2088_s19 + $0x8] sm:$0xff]   ;;  %v2106_v11 = vld [vmem:[%s2088_s19 + $0x10] sm:$0xff]   ;;  %vm764_vm7 = vcmask 1047559   ;;  %vm767_vm8 = vcmask 130048   ;;  %vm1903_vm9 = vmmov 0  }
  0x5c   : > { %v2111_v12 = vld [vmem:[%s2088_s19 + $0x18] sm:$0xff]   ;;  %v2114_v13 = vld [vmem:[%s2088_s19 + $0x20] sm:$0xff]   ;;  %v2119_v14 = vld [vmem:[%s2088_s19 + $0x28] sm:$0xff]   ;;  %s1494_s23 = sshll.u32 %s2084_s17, 3  ;;  %s1524_s13 = sshll.u32 %s1969_s4, 7 }
  0x5d   : > { %v2122_v15 = vld [vmem:[%s2088_s19 + $0x30] sm:$0xff]   ;;  %v2127_v16 = vld [vmem:[%s2088_s19 + $0x38] sm:$0xff]   ;;  %s328_s15 = scalar_lea.vmem [#allocation9], %s1494_s23  ;;  %s2439_s14 = scalar_lea.hbm %s2489_s7, %s1524_s13 }
  0x5e   : > { %1557 = vmatpush3.bf16.msra.mxu0 %v1681_v2  ;;  %v2133_v18 = vld [vmem:[%s2484_s2] ss:$0 sm:$0xff]  ;;  %s1392_s30 = sshll.u32 %s328_s15, 4  ;;  %s1379_s19 = scalar_lea.sflag [#allocation5], %s2084_s17  ;;  %s2441_s30 = int_to_ptr.vmem [resolvable:$true] %s1392_s30 }
  0x5f   : > { %1558 = vmatprep.subr.bf16.mxu0 %v1682_v3  ;;  %v2139_v22 = vld [vmem:[%s2485_s3] ss:$0 sm:$0xff]  ;;  %s1826_s8 = scalar_lea.vmem %s2441_s30, 128  ;;  %p2508_p2 = scmp.ne.s32.totalorder %s2500_s11, 0 }
  0x60   : > { %p1827_p5 = scmp.ne.s32.totalorder %s2441_s30, %s1826_s8  ;;  %s1904_s4 = smov [#allocation9]  }
  0x61   : > { %s1830_s10 = sshll.u32 %s1904_s4, 4  ;;  %s1831_s10 = int_to_ptr.vmem [resolvable:$false] %s1830_s10 }
  0x62   : > { %1559 = vmatpush3.bf16.msra.mxu0 %v1682_v3  ;;  %p1828_p7 = pnand %p1827_p5, %p2508_p2  ;;  %s1832_s20 = scalar_lea.vmem %s1831_s10, 256 }
  0x63   : > { %1560 = vmatprep.subr.bf16.mxu0 %v1683_v4  ;;  %p1833_p13 = scmp.lt.s32.totalorder %s2441_s30, %s1831_s10  ;;  %p1834_p0 = scmp.lt.s32.totalorder %s1832_s20, %s1826_s8 }
  0x64   : > { %p1829_p12 = pneg %p1828_p7 }
  0x65   : > { %p1835_p10 = por %p1834_p0, %p1833_p13 }
  0x66   : > { %1561 = vmatpush3.bf16.msra.mxu0 %v1683_v4 }
  0x67   : > { %1562 = vmatprep.subr.bf16.mxu0 %v1684_v6  ;;  %p1836_p3 = pnand %p1835_p10, %p1829_p12 }
  0x6a   : > { %1563 = vmatpush3.bf16.msra.mxu0 %v1684_v6 }
  0x6b   : > { %1564 = vmatprep.subr.bf16.mxu0 %v1685_v7 }
  0x6e   : > { %1565 = vmatpush3.bf16.msra.mxu0 %v1685_v7 }
  0x6f   : > { %1566 = vmatprep.subr.bf16.mxu0 %v1686_v8 }
  0x72   : > { %1567 = vmatpush3.bf16.msra.mxu0 %v1686_v8 }
  0x73   : > { %1568 = vmatprep.subr.bf16.mxu0 %v1687_v9 }
  0x76   : > { %1569 = vmatpush3.bf16.msra.mxu0 %v1687_v9 }
  0x79   : > { %1571 = vmatmul.mubr.bf16.vlgmr.msra.gmra.mxu0 %v2103_v10 }
  0x7a   : > { %1574 = vmatprep.mubr.bf16.mxu0 %v2106_v11 }
  0x81   : > { %1575 = vmatmul.mubr.bf16.gmra.mxu0 %v2111_v12 }
  0x82   : > { %1578 = vmatprep.mubr.bf16.mxu0 %v2114_v13 }
  0x89   : > { %1579 = vmatmul.mubr.bf16.gmra.mxu0 %v2119_v14 }
  0x8a   : > { %1582 = vmatprep.mubr.bf16.mxu0 %v2122_v15 }
  0x91   : > { %1583 = vmatmul.mubr.bf16.gmra.mxu0 %v2127_v16 }
 0x139   : > { %v1572_v19 = vpop.f32.mrf.mxu0 }
 0x13a   : > { %v509_v20 = vadd.f32 %v1572_v19, %v2133_v18 }
 0x13b   : > { %v500_v21 = vpop.f32.mrf.mxu0 }
 0x13c   : > { %v565_v23 = vmax.f32 %v509_v20, 0.0  ;;  %v501_v24 = vadd.f32 %v2133_v18, %v500_v21 }
 0x13d   : > { %v1573_v25 = vpop.f32.mrf.mxu0 }
 0x13e   : > { %v563_v26 = vmax.f32 %v501_v24, 0.0  ;;  %v512_v27 = vadd.f32 %v1573_v25, %v2133_v18  ;;  %v588_v28 = vmul.f32 %v2139_v22, %v565_v23 }
 0x13f   : > { %v503_v29 = vpop.f32.mrf.mxu0 }
 0x140   : > { %v566_v30 = vmax.f32 %v512_v27, 0.0  ;;  %v504_v31 = vadd.f32 %v2133_v18, %v503_v29  ;;  %606 = vadd.xlane.f32.xlu1 %v588_v28  ;;  %v586_v32 = vmul.f32 %v2139_v22, %v563_v26 }
 0x141   : > { %v1576_v33 = vpop.f32.mrf.mxu0 }
 0x142   : > { %v564_v34 = vmax.f32 %v504_v31, 0.0  ;;  %v525_v35 = vadd.f32 %v1576_v33, %v2133_v18  ;;  %602 = vadd.xlane.f32.xlu0 %v586_v32  ;;  %v589_v36 = vmul.f32 %v2139_v22, %v566_v30  ;;  %v1513_v30 = vld [vmem:[#allocation2] ss:$0 sm:$0xff] }
 0x143   : > { %v516_v37 = vpop.f32.mrf.mxu0 }
 0x144   : > { %v569_v38 = vmax.f32 %v525_v35, 0.0  ;;  %v517_v39 = vadd.f32 %v2133_v18, %v516_v37  ;;  %608 = vadd.xlane.f32.xlu1 %v589_v36  ;;  %v587_v40 = vmul.f32 %v2139_v22, %v564_v34 }
 0x145   : > { %v1577_v41 = vpop.f32.mrf.mxu0 }
 0x146   : > { %v528_v42 = vadd.f32 %v1577_v41, %v2133_v18  ;;  %604 = vadd.xlane.f32.xlu0 %v587_v40  ;;  %v592_v43 = vmul.f32 %v2139_v22, %v569_v38  ;;  %v567_v45 = vmax.f32 %v517_v39, 0.0  ;;  %v676_v40 = vlaneseq }
 0x147   : > { %v519_v44 = vpop.f32.mrf.mxu0 }
 0x148   : > { %v570_v46 = vmax.f32 %v528_v42, 0.0  ;;  %v520_v47 = vadd.f32 %v2133_v18, %v519_v44  ;;  %v590_v55 = vmul.f32 %v2139_v22, %v567_v45 }
 0x149   : > { %v1580_v48 = vpop.f32.mrf.mxu0 }
 0x14a   : > { %v568_v49 = vmax.f32 %v520_v47, 0.0  ;;  %v541_v50 = vadd.f32 %v1580_v48, %v2133_v18  ;;  %614 = vadd.xlane.f32.xlu0 %v592_v43  ;;  %v593_v51 = vmul.f32 %v2139_v22, %v570_v46  ;;  %v677_v43 = vand.u32 127, %v676_v40 }
 0x14b   : > { %v532_v52 = vpop.f32.mrf.mxu0 }
 0x14c   : > { %v573_v53 = vmax.f32 %v541_v50, 0.0  ;;  %v533_v54 = vadd.f32 %v2133_v18, %v532_v52  ;;  %616 = vadd.xlane.f32.xlu1 %v593_v51  ;;  %v591_v58 = vmul.f32 %v2139_v22, %v568_v49  ;;  %v682_v46 = vadd.s32 4294967288, %v677_v43 }
 0x14d   : > { %v1581_v56 = vpop.f32.mrf.mxu0 }
 0x14e   : > { %v544_v57 = vadd.f32 %v1581_v56, %v2133_v18  ;;  %610 = vadd.xlane.f32.xlu0 %v590_v55  ;;  %v596_v59 = vmul.f32 %v2139_v22, %v573_v53  ;;  %v571_v61 = vmax.f32 %v533_v54, 0.0 }
 0x14f   : > { %v535_v60 = vpop.f32.mrf.mxu0 }
 0x150   : > { %v574_v62 = vmax.f32 %v544_v57, 0.0  ;;  %v536_v63 = vadd.f32 %v2133_v18, %v535_v60  ;;  %612 = vadd.xlane.f32.xlu1 %v591_v58  ;;  %v594_v8 = vmul.f32 %v2139_v22, %v571_v61 }
 0x151   : > { %v1584_v0 = vpop.f32.mrf.mxu0 }
 0x152   : > { %v572_v1 = vmax.f32 %v536_v63, 0.0  ;;  %v557_v2 = vadd.f32 %v1584_v0, %v2133_v18  ;;  %622 = vadd.xlane.f32.xlu0 %v596_v59  ;;  %v597_v3 = vmul.f32 %v2139_v22, %v574_v62 }
 0x153   : > { %v548_v4 = vpop.f32.mrf.mxu0 }
 0x154   : > { %v577_v6 = vmax.f32 %v557_v2, 0.0  ;;  %v549_v7 = vadd.f32 %v2133_v18, %v548_v4  ;;  %624 = vadd.xlane.f32.xlu1 %v597_v3  ;;  %v595_v17 = vmul.f32 %v2139_v22, %v572_v1 }
 0x155   : > { %v1585_v9 = vpop.f32.mrf.mxu0 }
 0x156   : > { %618 = vadd.xlane.f32.xlu0 %v594_v8  ;;  %v600_v19 = vmul.f32 %v2139_v22, %v577_v6  ;;  %v575_v21 = vmax.f32 %v549_v7, 0.0  ;;  %v560_v23 = vadd.f32 %v1585_v9, %v2133_v18 }
 0x157   : > { %v551_v20 = vpop.f32.mrf.mxu0 }
 0x158   : > { %v552_v24 = vadd.f32 %v2133_v18, %v551_v20  ;;  %620 = vadd.xlane.f32.xlu1 %v595_v17  ;;  %v578_v26 = vmax.f32 %v560_v23, 0.0  ;;  %v598_v28 = vmul.f32 %v2139_v22, %v575_v21 }
 0x15a   : > { %v576_v25 = vmax.f32 %v552_v24, 0.0  ;;  %630 = vadd.xlane.f32.xlu0 %v600_v19  ;;  %v601_v29 = vmul.f32 %v2139_v22, %v578_v26 }
 0x15c   : > { %v599_v27 = vmul.f32 %v2139_v22, %v576_v25  ;;  %v2172_v22 = vshrl.u32 %v676_v40, 7 }
 0x15e   : > { %628 = vadd.xlane.f32.xlu1 %v599_v27  ;;  %626 = vadd.xlane.f32.xlu0 %v598_v28  ;;  %v2175_v49 = vsub.s32 %v677_v43, %v2172_v22  ;;  %v2178_v50 = vsub.s32 %v682_v46, %v2172_v22  ;;  %v786_v46 = vsub.s32 3, %v2172_v22 }
 0x162   : > { %632 = vadd.xlane.f32.xlu1 %v601_v29 }
 0x174   : > { %641 = vperm.xlu0 %1678, %v1513_v30  }
 0x1c9   : > { %v607_v32 = vpop.xlane.xlu1 %606 }
 0x1cb   : > { %v603_v31 = vpop.xlane.xlu0 %602 }
 0x1cd   : > { %v609_v18 = vpop.xlane.xlu1 %608 }
 0x1cf   : > { %v605_v33 = vpop.xlane.xlu0 %604 }
 0x1d3   : > { %v615_v34 = vpop.xlane.xlu0 %614 }
 0x1d5   : > { %v617_v36 = vpop.xlane.xlu1 %616 }
 0x1d7   : > { %v611_v35 = vpop.xlane.xlu0 %610 }
 0x1d9   : > { %v613_v38 = vpop.xlane.xlu1 %612 }
 0x1db   : > { %v623_v37 = vpop.xlane.xlu0 %622 }
 0x1dd   : > { %v625_v41 = vpop.xlane.xlu1 %624 }
 0x1df   : > { %v619_v39 = vpop.xlane.xlu0 %618 }
 0x1e1   : > { %v621_v44 = vpop.xlane.xlu1 %620 }
 0x1e3   : > { %v631_v42 = vpop.xlane.xlu0 %630 }
 0x1e7   : > { %v627_v45 = vpop.xlane.xlu0 %626  ;;  %v629_v47 = vpop.xlane.xlu1 %628 }
 0x1eb   : > { %v633_v1 = vpop.xlane.xlu1 %632 }
 0x1ef   : > { %v642_v48 = vpop.permute.xlu0 %641 }
 0x1f0   : > { %v2180_v51 = vadd.f32 %v642_v48, %v603_v31  ;;  %v2182_v52 = vadd.f32 %v642_v48, %v605_v33  ;;  %v2184_v53 = vadd.f32 %v642_v48, %v607_v32  ;;  %v2186_v54 = vadd.f32 %v642_v48, %v609_v18 }
 0x1f1   : > { %v2188_v55 = vadd.f32 %v642_v48, %v611_v35  ;;  %v2190_v56 = vadd.f32 %v642_v48, %v613_v38  ;;  %v2192_v57 = vadd.f32 %v642_v48, %v615_v34  ;;  %v2194_v58 = vadd.f32 %v642_v48, %v617_v36 }
 0x1f2   : > { %v2196_v59 = vadd.f32 %v642_v48, %v619_v39  ;;  %v2198_v60 = vadd.f32 %v642_v48, %v621_v44  ;;  %v2200_v61 = vadd.f32 %v642_v48, %v623_v37  ;;  %v2202_v62 = vadd.f32 %v642_v48, %v625_v41 }
 0x1f3   : > { %v2204_v63 = vadd.f32 %v642_v48, %v627_v45  ;;  %v2206_v0 = vadd.f32 %v642_v48, %v629_v47  ;;  %v681_v2 = vrot.slane %v2180_v51, %v2175_v49  ;;  %v686_v3 = vrot.slane %v2182_v52, %v2178_v50 }
 0x1f4   : > { %v692_v4 = vrot.slane %v2184_v53, %v2175_v49  ;;  %v696_v6 = vrot.slane %v2186_v54, %v2178_v50  ;;  %v2216_v7 = vadd.f32 %v642_v48, %v631_v42  ;;  %v2218_v8 = vadd.f32 %v642_v48, %v633_v1 }
 0x1f5   : > { %v701_v9 = vrot.slane %v2188_v55, %v2175_v49  ;;  %v705_v17 = vrot.slane %v2190_v56, %v2178_v50  ;;  %v688_v19 = vsel %vm687_vm0, %v686_v3, %v681_v2  ;;  %v710_v21 = vrot.slane %v2192_v57, %v2175_v49 }
 0x1f6   : > { %v697_v20 = vsel %vm687_vm0, %v696_v6, %v692_v4  ;;  %v714_v23 = vrot.slane %v2194_v58, %v2178_v50  ;;  %v719_v25 = vrot.slane %v2196_v59, %v2175_v49  ;;  %v723_v26 = vrot.slane %v2198_v60, %v2178_v50 }
 0x1f7   : > { %v706_v24 = vsel %vm687_vm0, %v705_v17, %v701_v9  ;;  %v728_v27 = vrot.slane %v2200_v61, %v2175_v49  ;;  %v732_v28 = vrot.slane %v2202_v62, %v2178_v50  ;;  %v737_v29 = vrot.slane %v2204_v63, %v2175_v49 }
 0x1f8   : > { %v741_v30 = vrot.slane %v2206_v0, %v2178_v50  ;;  %v753_v31 = vsel %vm752_vm1, %v697_v20, %v688_v19  ;;  %v715_v32 = vsel %vm687_vm0, %v714_v23, %v710_v21  ;;  %v746_v33 = vrot.slane %v2216_v7, %v2175_v49 }
 0x1f9   : > { %v750_v34 = vrot.slane %v2218_v8, %v2178_v50  ;;  %v755_v18 = vsel %vm754_vm2, %v706_v24, %v753_v31  ;;  %v724_v35 = vsel %vm687_vm0, %v723_v26, %v719_v25  ;;  %v733_v37 = vsel %vm687_vm0, %v732_v28, %v728_v27 }
 0x1fa   : > { %v757_v36 = vsel %vm756_vm3, %v715_v32, %v755_v18  ;;  %v742_v39 = vsel %vm687_vm0, %v741_v30, %v737_v29  ;;  %v774_v45 = vsub.s32 0, %v2172_v22  ;;  %v778_v48 = vsub.s32 1, %v2172_v22 }
 0x1fb   : > { %v759_v38 = vsel %vm758_vm4, %v724_v35, %v757_v36  ;;  %v751_v41 = vsel %vm687_vm0, %v750_v34, %v746_v33  ;;  %v790_v3 = vsub.s32 4, %v2172_v22  ;;  %v794_v19 = vsub.s32 5, %v2172_v22 }
 0x1fc   : > { %v761_v40 = vsel %vm760_vm5, %v733_v37, %v759_v38  ;;  %v798_v25 = vsub.s32 6, %v2172_v22  ;;  %v802_v30 = vsub.s32 7, %v2172_v22 }
 0x1fd   : > { %v763_v42 = vsel %vm762_vm6, %v742_v39, %v761_v40 }
 0x1fe   : > { %v765_v43 = vsel %vm764_vm7, %v751_v41, %v763_v42 }
 0x1ff   : > { %v768_v44 = vsel %vm767_vm8, %v765_v43, -inf }
 0x200   : > { %769 = vmax.xlane.f32.xlu1 %v768_v44 }
 0x289   : > { %v770_v47 = vpop.xlane.xlu1 %769 }
 0x28a   : > { %v775_v1 = vrot.slane %v770_v47, %v774_v45  ;;  %v787_v4 = vrot.slane %v770_v47, %v786_v46  ;;  %v779_v6 = vrot.slane %v770_v47, %v778_v48  ;;  %v791_v20 = vrot.slane %v770_v47, %v790_v3 }
 0x28b   : > { %v795_v26 = vrot.slane %v770_v47, %v794_v19  ;;  %v803_v34 = vrot.slane %v770_v47, %v802_v30 }
 0x28c   : > { %v812_v2 = vsub.f32 %v2180_v51, %v775_v1  ;;  %v813_v9 = vsub.f32 %v2182_v52, %v775_v1  ;;  %v819_v21 = vsub.f32 %v2194_v58, %v787_v4  ;;  %v782_v51 = vsub.s32 2, %v2172_v22  ;;  %v1698_v22 = vld [vmem:[#allocation8 + $0x28] sm:$0xff]  }
 0x28d   : > { %v814_v23 = vsub.f32 %v2184_v53, %v779_v6  ;;  %v821_v52 = vsub.f32 %v2198_v60, %v791_v20  ;;  %v815_v29 = vsub.f32 %v2186_v54, %v779_v6  ;;  %v799_v53 = vrot.slane %v770_v47, %v798_v25 }
 0x28e   : > { %v828_v17 = vmul.f32 1.442695, %v812_v2  ;;  %v830_v24 = vmul.f32 1.442695, %v813_v9  ;;  %v842_v27 = vmul.f32 1.442695, %v819_v21  ;;  %v783_v28 = vrot.slane %v770_v47, %v782_v51 }
 0x28f   : > { %v832_v58 = vmul.f32 1.442695, %v814_v23  ;;  %v823_v31 = vsub.f32 %v2202_v62, %v795_v26  ;;  %v846_v32 = vmul.f32 1.442695, %v821_v52  ;;  %v834_v60 = vmul.f32 1.442695, %v815_v29 }
 0x290   : > { %1712 = vpow2.f32 %v828_v17  ;;  %v816_v33 = vsub.f32 %v2188_v55, %v783_v28  ;;  %v825_v54 = vsub.f32 %v2206_v0, %v799_v53  ;;  %v817_v35 = vsub.f32 %v2190_v56, %v783_v28 }
 0x291   : > { %1714 = vpow2.f32 %v830_v24  ;;  %v850_v18 = vmul.f32 1.442695, %v823_v31  ;;  %v827_v62 = vsub.f32 %v2218_v8, %v803_v34  ;;  %v818_v38 = vsub.f32 %v2192_v57, %v787_v4 }
 0x292   : > { %1716 = vpow2.f32 %v842_v27  ;;  %v836_v36 = vmul.f32 1.442695, %v816_v33  ;;  %v854_v55 = vmul.f32 1.442695, %v825_v54  ;;  %v838_v39 = vmul.f32 1.442695, %v817_v35 }
 0x293   : > { %1718 = vpow2.f32 %v832_v58  ;;  %v858_v56 = vmul.f32 1.442695, %v827_v62  ;;  %v820_v41 = vsub.f32 %v2196_v59, %v791_v20  ;;  %v840_v42 = vmul.f32 1.442695, %v818_v38 }
 0x294   : > { %1720 = vpow2.f32 %v846_v32  ;;  %v822_v8 = vsub.f32 %v2200_v61, %v795_v26  ;;  %v824_v1 = vsub.f32 %v2204_v63, %v799_v53  ;;  %v826_v6 = vsub.f32 %v2216_v7, %v803_v34 }
 0x295   : > { %1722 = vpow2.f32 %v834_v60  ;;  %v844_v44 = vmul.f32 1.442695, %v820_v41 }
 0x296   : > { %1724 = vpow2.f32 %v850_v18  ;;  %v848_v2 = vmul.f32 1.442695, %v822_v8  ;;  %v852_v9 = vmul.f32 1.442695, %v824_v1  ;;  %v856_v20 = vmul.f32 1.442695, %v826_v6 }
 0x297   : > { %1726 = vpow2.f32 %v836_v36 }
 0x298   : > { %1728 = vpow2.f32 %v854_v55 }
 0x299   : > { %1730 = vpow2.f32 %v838_v39 }
 0x29a   : > { %1732 = vpow2.f32 %v858_v56 }
 0x29b   : > { %1734 = vpow2.f32 %v840_v42 }
 0x29c   : > { %1736 = vpow2.f32 %v844_v44 }
 0x29d   : > { %v2294_v37 = vpop.eup %1712  ;;  %1738 = vpow2.f32 %v848_v2 }
 0x29e   : > { %877 = vperm.xlu1 %1679, %v2294_v37   ;;  %v2299_v40 = vpop.eup %1714  ;;  %1740 = vpow2.f32 %v852_v9 }
 0x29f   : > { %v2302_v0 = vpop.eup %1716  ;;  %1742 = vpow2.f32 %v856_v20 }
 0x2a0   : > { %v2305_v43 = vpop.eup %1718  ;;  %898 = vperm.xlu0 %1678, %v2302_v0  }
 0x2a1   : > { %v2309_v57 = vpop.eup %1720 }
 0x2a2   : > { %880 = vperm.xlu1 %1679, %v2299_v40   ;;  %v2312_v47 = vpop.eup %1722 }
 0x2a3   : > { %v2316_v59 = vpop.eup %1724 }
 0x2a4   : > { %904 = vperm.xlu0 %1678, %v2309_v57   ;;  %v2319_v4 = vpop.eup %1726 }
 0x2a5   : > { %v2323_v61 = vpop.eup %1728 }
 0x2a6   : > { %883 = vperm.xlu1 %1679, %v2305_v43   ;;  %v2326_v17 = vpop.eup %1730 }
 0x2a7   : > { %v2330_v63 = vpop.eup %1732 }
 0x2a8   : > { %910 = vperm.xlu0 %1678, %v2316_v59   ;;  %v2332_v21 = vpop.eup %1734 }
 0x2a9   : > { %v2336_v7 = vpop.eup %1736 }
 0x2aa   : > { %886 = vperm.xlu1 %1679, %v2312_v47   ;;  %v2339_v23 = vpop.eup %1738 }
 0x2ab   : > { %v2342_v24 = vpop.eup %1740 }
 0x2ac   : > { %916 = vperm.xlu0 %1678, %v2323_v61   ;;  %v1743_v26 = vpop.eup %1742 }
 0x2ae   : > { %889 = vperm.xlu1 %1679, %v2319_v4  }
 0x2b0   : > { %922 = vperm.xlu0 %1678, %v2330_v63  }
 0x2b2   : > { %892 = vperm.xlu1 %1679, %v2326_v17  }
 0x2b6   : > { %895 = vperm.xlu1 %1679, %v2332_v21  }
 0x2ba   : > { %901 = vperm.xlu1 %1679, %v2336_v7  }
 0x2be   : > { %907 = vperm.xlu1 %1679, %v2339_v23  }
 0x2c2   : > { %913 = vperm.xlu1 %1679, %v2342_v24  }
 0x2c6   : > { %919 = vperm.xlu1 %1679, %v1743_v26  }
 0x319   : > { %v878_v52 = vpop.permute.xlu1 %877 }
 0x31a   : > { %v927_v42 = vrot.slane %v878_v52, %v2175_v49 }
 0x31b   : > { %v899_v58 = vpop.permute.xlu0 %898 }
 0x31c   : > { %v958_v41 = vrot.slane %v899_v58, %v2178_v50 }
 0x31d   : > { %v881_v27 = vpop.permute.xlu1 %880 }
 0x31e   : > { %v931_v62 = vrot.slane %v881_v27, %v2178_v50 }
 0x31f   : > { %v905_v31 = vpop.permute.xlu0 %904 }
 0x320   : > { %v967_v1 = vrot.slane %v905_v31, %v2178_v50  ;;  %v932_v9 = vsel %vm687_vm0, %v931_v62, %v927_v42 }
 0x321   : > { %v884_v28 = vpop.permute.xlu1 %883 }
 0x322   : > { %v936_v55 = vrot.slane %v884_v28, %v2175_v49 }
 0x323   : > { %v911_v60 = vpop.permute.xlu0 %910 }
 0x324   : > { %v976_v20 = vrot.slane %v911_v60, %v2178_v50 }
 0x325   : > { %v887_v29 = vpop.permute.xlu1 %886 }
 0x326   : > { %v940_v54 = vrot.slane %v887_v29, %v2178_v50 }
 0x327   : > { %v917_v18 = vpop.permute.xlu0 %916 }
 0x328   : > { %v941_v8 = vsel %vm687_vm0, %v940_v54, %v936_v55  ;;  %v985_v29 = vrot.slane %v917_v18, %v2178_v50 }
 0x329   : > { %v890_v53 = vpop.permute.xlu1 %889  ;;  %v996_v52 = vsel %vm752_vm1, %v941_v8, %v932_v9 }
 0x32a   : > { %v945_v39 = vrot.slane %v890_v53, %v2175_v49 }
 0x32b   : > { %v923_v58 = vpop.permute.xlu0 %922 }
 0x32c   : > { %v994_v54 = vrot.slane %v923_v58, %v2178_v50  ;;  %v1068_v58 = vunpack.c.h.bf16 %v2103_v10 }
 0x32d   : > { %v893_v32 = vpop.permute.xlu1 %892 }
 0x32e   : > { %v949_v35 = vrot.slane %v893_v32, %v2178_v50 }
 0x330   : > { %v950_v2 = vsel %vm687_vm0, %v949_v35, %v945_v39 }
 0x331   : > { %v896_v33 = vpop.permute.xlu1 %895  ;;  %v997_v31 = vsel %vm754_vm2, %v950_v2, %v996_v52 }
 0x332   : > { %v954_v38 = vrot.slane %v896_v33, %v2175_v49 }
 0x334   : > { %v959_v27 = vsel %vm687_vm0, %v958_v41, %v954_v38 }
 0x335   : > { %v902_v34 = vpop.permute.xlu1 %901  ;;  %v998_v33 = vsel %vm756_vm3, %v959_v27, %v997_v31  ;;  %v1070_v31 = vunpack.c.h.bf16 %v2106_v11 }
 0x336   : > { %v963_v56 = vrot.slane %v902_v34, %v2175_v49 }
 0x338   : > { %v968_v53 = vsel %vm687_vm0, %v967_v1, %v963_v56 }
 0x339   : > { %v908_v36 = vpop.permute.xlu1 %907  ;;  %v999_v35 = vsel %vm758_vm4, %v968_v53, %v998_v33  ;;  %v1066_v53 = vunpack.c.h.bf16 %v2099_v5  ;;  %v1067_v33 = vunpack.c.l.bf16 %v2103_v10 }
 0x33a   : > { %v972_v44 = vrot.slane %v908_v36, %v2175_v49 }
 0x33c   : > { %v977_v32 = vsel %vm687_vm0, %v976_v20, %v972_v44 }
 0x33d   : > { %v914_v6 = vpop.permute.xlu1 %913  ;;  %v1000_v36 = vsel %vm760_vm5, %v977_v32, %v999_v35 }
 0x33e   : > { %v981_v28 = vrot.slane %v914_v6, %v2175_v49 }
 0x340   : > { %v986_v34 = vsel %vm687_vm0, %v985_v29, %v981_v28 }
 0x341   : > { %v920_v60 = vpop.permute.xlu1 %919  ;;  %v1001_v55 = vsel %vm762_vm6, %v986_v34, %v1000_v36  ;;  %v1072_v34 = vunpack.c.h.bf16 %v2111_v12 }
 0x342   : > { %v990_v18 = vrot.slane %v920_v60, %v2175_v49  ;;  %v1065_v60 = vunpack.c.l.bf16 %v2099_v5 }
 0x344   : > { %v995_v62 = vsel %vm687_vm0, %v994_v54, %v990_v18  ;;  %v1069_v54 = vunpack.c.l.bf16 %v2106_v11  ;;  %v1071_v18 = vunpack.c.l.bf16 %v2111_v12 }
 0x345   : > { %v1002_v38 = vsel %vm764_vm7, %v995_v62, %v1001_v55 }
 0x346   : > { %v1004_v39 = vsel %vm767_vm8, %v1002_v38, 0.0  ;;  %v1074_v38 = vunpack.c.h.bf16 %v2114_v13 }
 0x347   : > { %1005 = vadd.xlane.f32.xlu1 %v1004_v39 }
 0x3d0   : > { %v1006_v56 = vpop.xlane.xlu1 %1005 }
 0x3d1   : > { %1744 = vrcp.f32 %v1006_v56 }
 0x3de   : > { %v1745_v41 = vpop.eup %1744 }
 0x3df   : > { %v1028_v50 = vrot.slane %v1745_v41, %v790_v3  ;;  %v1012_v49 = vrot.slane %v1745_v41, %v774_v45  ;;  %v1040_v44 = vrot.slane %v1745_v41, %v802_v30  ;;  %v1016_v6 = vrot.slane %v1745_v41, %v778_v48 }
 0x3e1   : > { %v1058_v42 = vmul.f32 %v2309_v57, %v1028_v50  ;;  %v1049_v8 = vmul.f32 %v2294_v37, %v1012_v49  ;;  %v1063_v1 = vmul.f32 %v1743_v26, %v1040_v44  ;;  %v1050_v2 = vmul.f32 %v2299_v40, %v1012_v49 }
 0x3e2   : > { %v1051_v3 = vmul.f32 %v2305_v43, %v1016_v6  ;;  %v1052_v45 = vmul.f32 %v2312_v47, %v1016_v6  ;;  %v1020_v37 = vrot.slane %v1745_v41, %v782_v51  ;;  %v1024_v40 = vrot.slane %v1745_v41, %v786_v46 }
 0x3e3   : > { %1128 = vperm.xlu1 %1679, %v1058_v42   ;;  %1083 = vperm.xlu0 %1678, %v1049_v8   ;;  %v1057_v47 = vmul.f32 %v2336_v7, %v1028_v50  ;;  %v1032_v51 = vrot.slane %v1745_v41, %v794_v19  ;;  %v1036_v46 = vrot.slane %v1745_v41, %v798_v25  ;;  %v1696_v19 = vld [vmem:[#allocation8 + $0x38] sm:$0xff]   ;;  %v1902_v26 = vmov 0.0   ;;  %v1699_v25 = vld [vmem:[#allocation8 + $0x20] sm:$0xff]  }
 0x3e4   : > { %v1053_v30 = vmul.f32 %v2319_v4, %v1020_v37  ;;  %v1054_v57 = vmul.f32 %v2326_v17, %v1020_v37  ;;  %v1055_v48 = vmul.f32 %v2332_v21, %v1024_v40  ;;  %v1056_v43 = vmul.f32 %v2302_v0, %v1024_v40  ;;  %1586 = vmatprep.subr.bf16.mxu1 %v1902_v26 }
 0x3e5   : > { %v1059_v4 = vmul.f32 %v2339_v23, %v1032_v51  ;;  %v1060_v17 = vmul.f32 %v2316_v59, %v1032_v51  ;;  %v1061_v21 = vmul.f32 %v2342_v24, %v1036_v46  ;;  %v1062_v0 = vmul.f32 %v2323_v61, %v1036_v46  ;;  %1587 = vmatpush3.bf16.msra.mxu1 %v1696_v19  ;;  %v1697_v23 = vld [vmem:[#allocation8 + $0x30] sm:$0xff]   ;;  %v1700_v59 = vld [vmem:[#allocation8 + $0x18] sm:$0xff]   ;;  %v1703_v24 = vld [vmem:[#allocation8] sm:$0xff]  }
 0x3e6   : > { %v1064_v7 = vmul.f32 %v2330_v63, %v1040_v44  ;;  %1588 = vmatprep.subr.bf16.mxu1 %v1902_v26  ;;  %1602 = vmatprep.mubr.msk.bf16.mxu1 %vm1903_vm9, %v1902_v26  ;;  %v1701_v61 = vld [vmem:[#allocation8 + $0x10] sm:$0xff]   ;;  %v1702_v63 = vld [vmem:[#allocation8 + $0x8] sm:$0xff]   ;;  %v1073_v41 = vunpack.c.l.bf16 %v2114_v13  ;;  %v1075_v40 = vunpack.c.l.bf16 %v2119_v14  ;;  %v1076_v13 = vunpack.c.h.bf16 %v2119_v14 }
 0x3e7   : > { %1153 = vperm.xlu1 %1679, %v1063_v1   ;;  %1088 = vperm.xlu0 %1678, %v1050_v2   ;;  %v1078_v14 = vunpack.c.h.bf16 %v2122_v15 }
 0x3e9   : > { %1589 = vmatpush3.bf16.msra.mxu1 %v1697_v23 }
 0x3ea   : > { %1590 = vmatprep.subr.bf16.mxu1 %v1902_v26 }
 0x3eb   : > { %1093 = vperm.xlu0 %1678, %v1051_v3  }
 0x3ed   : > { %1591 = vmatpush3.bf16.msra.mxu1 %v1698_v22 }
 0x3ee   : > { %1592 = vmatprep.subr.bf16.mxu1 %v1902_v26 }
 0x3ef   : > { %1098 = vperm.xlu0 %1678, %v1052_v45  }
 0x3f1   : > { %1593 = vmatpush3.bf16.msra.mxu1 %v1699_v25 }
 0x3f2   : > { %1594 = vmatprep.subr.bf16.mxu1 %v1902_v26 }
 0x3f3   : > { %1103 = vperm.xlu0 %1678, %v1053_v30  }
 0x3f5   : > { %1595 = vmatpush3.bf16.msra.mxu1 %v1700_v59 }
 0x3f6   : > { %1596 = vmatprep.subr.bf16.mxu1 %v1902_v26 }
 0x3f7   : > { %1108 = vperm.xlu0 %1678, %v1054_v57  }
 0x3f9   : > { %1597 = vmatpush3.bf16.msra.mxu1 %v1701_v61  ;;  %v1077_v61 = vunpack.c.l.bf16 %v2122_v15 }
 0x3fa   : > { %1598 = vmatprep.subr.bf16.mxu1 %v1902_v26 }
 0x3fb   : > { %1113 = vperm.xlu0 %1678, %v1055_v48  }
 0x3fd   : > { %1599 = vmatpush3.bf16.msra.mxu1 %v1702_v63 }
 0x3fe   : > { %1600 = vmatprep.subr.bf16.mxu1 %v1902_v26 }
 0x3ff   : > { %1118 = vperm.xlu0 %1678, %v1056_v43  }
 0x401   : > { %1601 = vmatpush3.bf16.msra.mxu1 %v1703_v24 }
 0x403   : > { %1123 = vperm.xlu0 %1678, %v1057_v47  }
 0x407   : > { %1133 = vperm.xlu0 %1678, %v1059_v4  }
 0x40b   : > { %1138 = vperm.xlu0 %1678, %v1060_v17  }
 0x40f   : > { %1143 = vperm.xlu0 %1678, %v1061_v21  }
 0x413   : > { %1148 = vperm.xlu0 %1678, %v1062_v0  }
 0x417   : > { %1158 = vperm.xlu0 %1678, %v1064_v7  }
 0x45e   : > { %v1084_v9 = vpop.permute.xlu0 %1083  ;;  %v1129_v50 = vpop.permute.xlu1 %1128 }
 0x45f   : > { %v1161_v10 = vmul.f32 %v1084_v9, %v1065_v60  ;;  %v1170_v1 = vmul.f32 %v1129_v50, %v1074_v38 }
 0x462   : > { %v1089_v20 = vpop.permute.xlu0 %1088 }
 0x463   : > { %v1162_v36 = vmul.f32 %v1089_v20, %v1066_v53  ;;  %v1079_v20 = vunpack.c.l.bf16 %v2127_v16 }
 0x465   : > { %v1177_v5 = vadd.f32 %v1162_v36, %v1161_v10 }
 0x466   : > { %v1094_v27 = vpop.permute.xlu0 %1093 }
 0x467   : > { %v1163_v39 = vmul.f32 %v1094_v27, %v1067_v33  ;;  %v1178_v45 = vrot.slane %v1177_v5, 4 }
 0x469   : > { %v1179_v47 = vadd.f32 %v1178_v45, %v1177_v5 }
 0x46a   : > { %v1099_v28 = vpop.permute.xlu0 %1098 }
 0x46b   : > { %v1164_v35 = vmul.f32 %v1099_v28, %v1068_v58  ;;  %v1180_v26 = vrot.slane %v1179_v47, 2  ;;  %v1154_v58 = vpop.permute.xlu1 %1153 }
 0x46c   : > { %v1175_v15 = vmul.f32 %v1154_v58, %v1079_v20 }
 0x46d   : > { %v1184_v42 = vadd.f32 %v1164_v35, %v1163_v39  ;;  %v1181_v27 = vadd.f32 %v1180_v26, %v1179_v47 }
 0x46e   : > { %v1104_v29 = vpop.permute.xlu0 %1103 }
 0x46f   : > { %v1165_v49 = vmul.f32 %v1104_v29, %v1069_v54  ;;  %v1185_v6 = vrot.slane %v1184_v42, 4 }
 0x471   : > { %v1186_v43 = vadd.f32 %v1185_v6, %v1184_v42 }
 0x472   : > { %v1109_v52 = vpop.permute.xlu0 %1108 }
 0x473   : > { %v1166_v62 = vmul.f32 %v1109_v52, %v1070_v31  ;;  %v1187_v7 = vrot.slane %v1186_v43, 2  ;;  %v1080_v52 = vunpack.c.h.bf16 %v2127_v16 }
 0x475   : > { %v1191_v44 = vadd.f32 %v1166_v62, %v1165_v49  ;;  %v1188_v24 = vadd.f32 %v1187_v7, %v1186_v43  ;;  %v1182_v62 = vrot.slane %v1181_v27, 1 }
 0x476   : > { %v1114_v32 = vpop.permute.xlu0 %1113 }
 0x477   : > { %v1167_v8 = vmul.f32 %v1114_v32, %v1071_v18  ;;  %v1192_v37 = vrot.slane %v1191_v44, 4  ;;  %v1189_v60 = vrot.slane %v1188_v24, 1  ;;  %v1183_v42 = vadd.f32 %v1182_v62, %v1181_v27  ;;  %v1514_v27 = vld [vmem:[%s2488_s6] ss:$0 sm:$0xff] }
 0x479   : > { %v1193_v51 = vadd.f32 %v1192_v37, %v1191_v44  ;;  %v1233_v45 = vpack.c.bf16 %v1183_v42, %v1183_v42 }
 0x47a   : > { %v1119_v55 = vpop.permute.xlu0 %1118 }
 0x47b   : > { %v1168_v56 = vmul.f32 %v1119_v55, %v1072_v34  ;;  %v1194_v23 = vrot.slane %v1193_v51, 2 }
 0x47d   : > { %v1198_v2 = vadd.f32 %v1168_v56, %v1167_v8  ;;  %v1195_v28 = vadd.f32 %v1194_v23, %v1193_v51 }
 0x47e   : > { %v1124_v11 = vpop.permute.xlu0 %1123 }
 0x47f   : > { %v1169_v12 = vmul.f32 %v1124_v11, %v1073_v41  ;;  %v1199_v57 = vrot.slane %v1198_v2, 4  ;;  %v1196_v18 = vrot.slane %v1195_v28, 1  ;;  %v1190_v41 = vadd.f32 %v1189_v60, %v1188_v24 }
 0x481   : > { %v1205_v3 = vadd.f32 %v1170_v1, %v1169_v12  ;;  %v1200_v17 = vadd.f32 %v1199_v57, %v1198_v2  ;;  %v1197_v49 = vadd.f32 %v1196_v18, %v1195_v28  ;;  %v1234_v1 = vpack.c.bf16 %v1190_v41, %v1190_v41 }
 0x482   : > { %v1134_v30 = vpop.permute.xlu0 %1133 }
 0x483   : > { %v1206_v48 = vrot.slane %v1205_v3, 4  ;;  %v1171_v46 = vmul.f32 %v1134_v30, %v1075_v40  ;;  %v1201_v25 = vrot.slane %v1200_v17, 2 }
 0x485   : > { %v1207_v0 = vadd.f32 %v1206_v48, %v1205_v3  ;;  %v1202_v53 = vadd.f32 %v1201_v25, %v1200_v17  ;;  %v1235_v3 = vpack.c.bf16 %v1197_v49, %v1197_v49 }
 0x486   : > { %v1139_v4 = vpop.permute.xlu0 %1138 }
 0x487   : > { %v1172_v21 = vmul.f32 %v1139_v4, %v1076_v13  ;;  %v1208_v63 = vrot.slane %v1207_v0, 2  ;;  %v1203_v55 = vrot.slane %v1202_v53, 1  ;;  %v1273_v13 = vunpack.c.l.b16 %v1234_v1 }
 0x488   : > { %v1274_v51 = vunpack.c.l.b16 %v1235_v3  ;;  %v1272_v4 = vunpack.c.l.b16 %v1233_v45 }
 0x489   : > { %v1212_v19 = vadd.f32 %v1172_v21, %v1171_v46  ;;  %v1209_v34 = vadd.f32 %v1208_v63, %v1207_v0  ;;  %v1204_v8 = vadd.f32 %v1203_v55, %v1202_v53 }
 0x48a   : > { %v1144_v22 = vpop.permute.xlu0 %1143  ;;  %v1280_v7 = vsel %vm752_vm1, %v1273_v13, %v1272_v4 }
 0x48b   : > { %v1213_v59 = vrot.slane %v1212_v19, 4  ;;  %v1173_v32 = vmul.f32 %v1144_v22, %v1077_v61  ;;  %v1210_v56 = vrot.slane %v1209_v34, 1  ;;  %v1236_v37 = vpack.c.bf16 %v1204_v8, %v1204_v8 }
 0x48c   : > { %v1281_v23 = vsel %vm754_vm2, %v1274_v51, %v1280_v7 }
 0x48d   : > { %v1214_v9 = vadd.f32 %v1213_v59, %v1212_v19  ;;  %v1211_v11 = vadd.f32 %v1210_v56, %v1209_v34  ;;  %v1275_v17 = vunpack.c.l.b16 %v1236_v37 }
 0x48e   : > { %v1149_v29 = vpop.permute.xlu0 %1148 }
 0x48f   : > { %v1215_v31 = vrot.slane %v1214_v9, 2  ;;  %v1174_v33 = vmul.f32 %v1149_v29, %v1078_v14  ;;  %v1237_v40 = vpack.c.bf16 %v1211_v11, %v1211_v11  ;;  %v1282_v59 = vsel %vm756_vm3, %v1275_v17, %v1281_v23 }
 0x491   : > { %v1216_v54 = vadd.f32 %v1215_v31, %v1214_v9  ;;  %v1219_v35 = vadd.f32 %v1174_v33, %v1173_v32  ;;  %v1276_v0 = vunpack.c.l.b16 %v1237_v40 }
 0x492   : > { %v1159_v36 = vpop.permute.xlu0 %1158 }
 0x493   : > { %v1220_v38 = vrot.slane %v1219_v35, 4  ;;  %v1176_v39 = vmul.f32 %v1159_v36, %v1080_v52  ;;  %v1217_v50 = vrot.slane %v1216_v54, 1  ;;  %v1283_v61 = vsel %vm758_vm4, %v1276_v0, %v1282_v59 }
 0x495   : > { %v1221_v16 = vadd.f32 %v1220_v38, %v1219_v35  ;;  %v1226_v10 = vadd.f32 %v1176_v39, %v1175_v15  ;;  %v1218_v2 = vadd.f32 %v1217_v50, %v1216_v54 }
 0x497   : > { %v1222_v5 = vrot.slane %v1221_v16, 2  ;;  %v1227_v44 = vrot.slane %v1226_v10, 4  ;;  %v1238_v48 = vpack.c.bf16 %v1218_v2, %v1218_v2 }
 0x499   : > { %v1223_v12 = vadd.f32 %v1222_v5, %v1221_v16  ;;  %v1228_v6 = vadd.f32 %v1227_v44, %v1226_v10  ;;  %v1277_v19 = vunpack.c.l.b16 %v1238_v48 }
 0x49b   : > { %v1224_v30 = vrot.slane %v1223_v12, 1  ;;  %v1229_v57 = vrot.slane %v1228_v6, 2  ;;  %v1284_v63 = vsel %vm760_vm5, %v1277_v19, %v1283_v61 }
 0x49d   : > { %v1225_v43 = vadd.f32 %v1224_v30, %v1223_v12  ;;  %v1230_v47 = vadd.f32 %v1229_v57, %v1228_v6 }
 0x49f   : > { %v1239_v46 = vpack.c.bf16 %v1225_v43, %v1225_v43  ;;  %v1231_v21 = vrot.slane %v1230_v47, 1 }
 0x4a1   : > { %v1232_v26 = vadd.f32 %v1231_v21, %v1230_v47  ;;  %v1278_v22 = vunpack.c.l.b16 %v1239_v46 }
 0x4a3   : > { %v1240_v25 = vpack.c.bf16 %v1232_v26, %v1232_v26  ;;  %v1285_v24 = vsel %vm762_vm6, %v1278_v22, %v1284_v63 }
 0x4a5   : > { %v1279_v14 = vunpack.c.l.b16 %v1240_v25 }
 0x4a7   : > { %v1286_v9 = vsel %vm764_vm7, %v1279_v14, %v1285_v24 }
 0x4a8   : > { %v1287_v20 = vpack.c.b16 %v1286_v9, %v1286_v9 }
 0x4aa   : > { %1603 = vmatmul.mubr.bf16.vlgmr.msra.gmra.mxu1 %v1287_v20 }
 0x56a   : > { %v1371_v28 = vpop.f32.mrf.mxu1 }
 0x56b   : > { %v1372_v29 = vadd.f32 %v1514_v27, %v1371_v28 }
 0x56c   : > { %v1604_v52 = vpop.f32.mrf.mxu1 }
 0x56d   : > { %1377 = vst [vmem:[%s328_s15] sm:$0xff] %v1372_v29 }
 0x56e   : > { %v1374_v58 = vpop.f32.mrf.mxu1 }
 0x56f   : > { %1839 = shalt.err (!%p1836_p3)
}
 0x570   : > { %s1840_s22 = scalar_lea.hbm %s2439_s14, 128  ;;  %s1844_s25 = scalar_lea.hbm %s2489_s7, 256 }
 0x571   : > { %p1841_p11 = scmp.ne.s32.totalorder %s2439_s14, %s1840_s22  ;;  %p1845_p4 = scmp.lt.s32.totalorder %s2439_s14, %s2489_s7 }
 0x572   : > { %p1846_p6 = scmp.lt.s32.totalorder %s1844_s25, %s1840_s22 }
 0x573   : > { %p1842_p9 = pnand %p1841_p11, %p2508_p2 }
 0x574   : > { %p1847_p8 = por %p1846_p6, %p1845_p4 }
 0x575   : > { %p1843_p1 = pneg %p1842_p9 }
 0x577   : > { %p1848_p5 = pnand %p1847_p8, %p1843_p1 }
 0x579   : > { %1851 = shalt.err (!%p1848_p5)
}
 0x57a   : > { %1616 = dma.vmem_to_hbm [thread:$0]  (%p2508_p2), %s2441_s30, 128, %s2439_s14, %s1379_s19   ;;  %v1605_v53 = vpop.f32.mrf.mxu1 }
 0x57b PF: > { %s1404_s15 = sand.u32 1, %s1882_s26   ;;  %p2509_p7 = scmp.ne.s32.totalorder %s2497_s9, 0 }
 0x57c   : > { %p2510_p12 = scmp.ge.s32.totalorder %s1894_s29, 2  ;;  %s1405_s16 = scalar_lea.sflag [#allocation5], %s1404_s15 }
 0x57e   : > { %p1630_p13 = pnand %p2510_p12, %p2509_p7 }
 0x580   : > { %p1631_p0 = pneg %p1630_p13 }
 0x582   : > { %1877 = dma.done.wait (%p1631_p0), %s1405_s16, 128  }
 0x583   : > { %1879 = vsyncadd (%p1631_p0), %s1405_s16, 4294967168  ;;  %p23_p10 = scmp.ge.s32.totalorder %s2026_s24, 4   ;;  %s2511_s26 = smov %s1886_s27 }
 0x584   : > { %s2512_s27 = smov %s1890_s28  ;;  %s2513_s28 = smov %s2042_s12 }
 0x585   : > { %s2514_s29 = smov %s2026_s24  ;;  %25 = sbr.rel (!%p23_p10) target bundleno = 9 (0x9), region = 101 }
 0x58a   :  { %1410 = vsyncpa [#allocation4], 1 }
 0x58b   :  { %1412 = vsyncpa [#allocation4 + $0x1], 1 }
 0x58c   :  { %1413 = vsyncpa [#allocation7], 1 }
 0x58d   :  { %1414 = vsyncpa [#allocation5], 1 }
 0x58e   :  { %1416 = vsyncpa [#allocation5 + $0x1], 1 }

</bundles_post_ra>
